<compile_context>
chip_gen: v5e
topology: v5e:2x2
jax: 0.10.0
libtpu: 0.0.40
codegen_flags: <defaults>
</compile_context>

<pallas_src>
import jax
import jax.numpy as jnp
from jax.experimental import pallas as pl
from jax.experimental.pallas import tpu as pltpu

_LANE = 128


def _round_up(x, m):
    return ((x + m - 1) // m) * m


def _vmem_limit_bytes():
    """Per-generation scoped-VMEM limit with headroom below physical capacity."""
    cap = None
    try:
        cap = getattr(pltpu.get_tpu_info(), "vmem_capacity_bytes", None)
    except Exception:
        cap = None
    if not cap:
        cap = 64 * 1024 * 1024  # conservative default (v7x per-TC VMEM)
    # 3/4 of physical, capped at 100 MiB on the 128 MiB parts.
    return int(min(cap * 3 // 4, 100 * 1024 * 1024))


# ----------------------------------------------------------------------------
# Pass 1: conv-as-matmul + per-tile partial BatchNorm statistics
# ----------------------------------------------------------------------------
def _conv_stats_kernel(p_ref, w_ref, y_ref, sum_ref, ssq_ref):
    # p_ref:   (TILE_M, K)          bf16 im2col patch tile (K unpadded)
    # w_ref:   (K, Cout_pad)        bf16 flattened weights (constant block -> resident)
    # y_ref:   (TILE_M, Cout_pad)   bf16 conv output tile
    # sum_ref: (1, 1, Cout_pad)     f32 per-tile partial channel sum
    # ssq_ref: (1, 1, Cout_pad)     f32 per-tile partial channel sum of squares
    acc = jnp.dot(p_ref[...], w_ref[...], preferred_element_type=jnp.float32)
    y_ref[...] = acc.astype(y_ref.dtype)
    s = jnp.sum(acc, axis=0, keepdims=True)          # (1, Cout_pad), from f32 acc
    sq = jnp.sum(acc * acc, axis=0, keepdims=True)   # (1, Cout_pad)
    sum_ref[...] = s.reshape(sum_ref.shape)
    ssq_ref[...] = sq.reshape(ssq_ref.shape)


# ----------------------------------------------------------------------------
# Pass 2: elementwise BatchNorm apply (y * scale + shift), f32 math, lane-dense
# ----------------------------------------------------------------------------
def _bn_apply_kernel(y_ref, scale_ref, shift_ref, o_ref):
    y = y_ref[...].astype(jnp.float32)
    o_ref[...] = (y * scale_ref[...] + shift_ref[...]).astype(o_ref.dtype)


def _im2col(x_pad, KH, KW, OH, OW, stride, dilation):
    """x_pad: (N, Hp, Wp, Cin) -> (N*OH*OW, KH*KW*Cin), tap-major then channel."""
    N, Hp, Wp, Cin = x_pad.shape
    cols = []
    for kh in range(KH):
        for kw in range(KW):
            h0 = kh * dilation
            w0 = kw * dilation
            patch = jax.lax.slice(
                x_pad,
                (0, h0, w0, 0),
                (N, h0 + (OH - 1) * stride + 1, w0 + (OW - 1) * stride + 1, Cin),
                (1, stride, stride, 1),
            )  # (N, OH, OW, Cin)
            cols.append(patch)
    patches = jnp.stack(cols, axis=3)                 # (N, OH, OW, KH*KW, Cin)
    return patches.reshape(N * OH * OW, KH * KW * Cin)


def basic_conv2d(x_nchw, w_oihw, gamma, beta, *,
                 stride=1, padding=0, dilation=1, eps=1e-5, tile_m=512):
    """BasicConv2d forward. x: NCHW, w: OIHW (PyTorch conventions)."""
    N, Cin, H, W = x_nchw.shape
    Cout, _, KH, KW = w_oihw.shape

    OH = (H + 2 * padding - dilation * (KH - 1) - 1) // stride + 1
    OW = (W + 2 * padding - dilation * (KW - 1) - 1) // stride + 1
    M = N * OH * OW
    K = KH * KW * Cin                      # unpadded contraction dim
    Cout_pad = _round_up(Cout, _LANE)

    vmem_limit = _vmem_limit_bytes()
    out_itemsize = jnp.dtype(x_nchw.dtype).itemsize

    # ---- pass-1 row tile: multiple of 256 when possible, never < 16 ---------
    if M >= 256:
        tile_m1 = _round_up(max(256, min(tile_m, M)), 256)
    else:
        tile_m1 = _round_up(max(16, min(tile_m, M)), 16)

    def _pass1_bytes(tm):
        # double-buffered bf16 patches + double-buffered bf16 y + (double-
        # buffered, never-changing) bf16 weights + tiny f32 stats blocks.
        return (2 * tm * K * 2 + 2 * tm * Cout_pad * 2
                + 2 * K * Cout_pad * 2 + 4 * 2 * Cout_pad * 4)

    while tile_m1 > 16 and _pass1_bytes(tile_m1) > int(vmem_limit * 0.8):
        tile_m1 = max(16, _round_up(tile_m1 // 2, 16))

    # ---- pass-2 row tile: bigger (elementwise), a multiple of tile_m1 -------
    steps1 = pl.cdiv(M, tile_m1)
    mult = max(1, min(max(1, 4096 // tile_m1), steps1))
    while mult > 1 and (2 * tile_m1 * mult * Cout_pad * (2 + out_itemsize)
                        + 2 * Cout_pad * 4) > int(vmem_limit * 0.8):
        mult //= 2
    tile_m2 = tile_m1 * mult

    M_pad = _round_up(M, tile_m2)          # multiple of both tile_m1 and tile_m2
    num_tiles1 = M_pad // tile_m1
    num_tiles2 = M_pad // tile_m2

    # ---- wrapper-side layout glue (pure XLA) --------------------------------
    x_nhwc = jnp.transpose(x_nchw, (0, 2, 3, 1))
    x_sp = jnp.pad(x_nhwc, ((0, 0), (padding, padding), (padding, padding), (0, 0)))
    patches = _im2col(x_sp, KH, KW, OH, OW, stride, dilation)          # (M, K)
    patches = jnp.pad(patches, ((0, M_pad - M), (0, 0)))               # rows only
    patches = patches.astype(jnp.bfloat16)                             # MXU operand

    w_flat = jnp.transpose(w_oihw, (2, 3, 1, 0)).reshape(K, Cout)      # (KH*KW*Cin, Cout)
    w_mat = jnp.pad(w_flat, ((0, 0), (0, Cout_pad - Cout))).astype(jnp.bfloat16)

    # ---- pass 1: conv matmul + partial stats --------------------------------
    cost = pl.CostEstimate(
        flops=2 * M_pad * K * Cout_pad,
        transcendentals=0,
        bytes_accessed=(patches.size * 2 + w_mat.size * 2
                        + M_pad * Cout_pad * 2 + 2 * num_tiles1 * Cout_pad * 4),
    )
    conv_bf16, psum, pssq = pl.pallas_call(
        _conv_stats_kernel,
        out_shape=(
            jax.ShapeDtypeStruct((M_pad, Cout_pad), jnp.bfloat16),
            jax.ShapeDtypeStruct((num_tiles1, 1, Cout_pad), jnp.float32),
            jax.ShapeDtypeStruct((num_tiles1, 1, Cout_pad), jnp.float32),
        ),
        grid_spec=pltpu.PrefetchScalarGridSpec(
            num_scalar_prefetch=0,
            grid=(num_tiles1,),
            in_specs=[
                pl.BlockSpec((tile_m1, K), lambda i: (i, 0)),        # unpadded K
                pl.BlockSpec((K, Cout_pad), lambda i: (0, 0)),       # resident weights
            ],
            out_specs=(
                pl.BlockSpec((tile_m1, Cout_pad), lambda i: (i, 0)),
                pl.BlockSpec((1, 1, Cout_pad), lambda i: (i, 0, 0)),
                pl.BlockSpec((1, 1, Cout_pad), lambda i: (i, 0, 0)),
            ),
        ),
        compiler_params=pltpu.CompilerParams(
            dimension_semantics=("parallel",),
            vmem_limit_bytes=vmem_limit,
        ),
        cost_estimate=cost,
    )(patches, w_mat)

    # ---- finalize BatchNorm stats (tiny per-channel math, plain XLA) --------
    # Training-mode (batch) statistics, biased variance over (N, H, W).
    # Zero-padded M rows / Cout channels contribute zero to both sums.
    sum_c = jnp.sum(psum[:, 0, :], axis=0)                 # (Cout_pad,)
    ssq_c = jnp.sum(pssq[:, 0, :], axis=0)                 # (Cout_pad,)
    mean = sum_c / M
    var = jnp.maximum(ssq_c / M - mean * mean, 0.0)
    gamma_p = jnp.pad(gamma.astype(jnp.float32), (0, Cout_pad - Cout))
    beta_p = jnp.pad(beta.astype(jnp.float32), (0, Cout_pad - Cout))
    inv_std = jax.lax.rsqrt(var + eps)
    scale = (gamma_p * inv_std).reshape(1, Cout_pad)
    shift = (beta_p - mean * gamma_p * inv_std).reshape(1, Cout_pad)

    # ---- pass 2: elementwise normalize (bf16 in, f32 math, x.dtype out) -----
    out2d = pl.pallas_call(
        _bn_apply_kernel,
        out_shape=jax.ShapeDtypeStruct((M_pad, Cout_pad), x_nchw.dtype),
        grid_spec=pltpu.PrefetchScalarGridSpec(
            num_scalar_prefetch=0,
            grid=(num_tiles2,),
            in_specs=[
                pl.BlockSpec((tile_m2, Cout_pad), lambda i: (i, 0)),
                pl.BlockSpec((1, Cout_pad), lambda i: (0, 0)),
                pl.BlockSpec((1, Cout_pad), lambda i: (0, 0)),
            ],
            out_specs=pl.BlockSpec((tile_m2, Cout_pad), lambda i: (i, 0)),
        ),
        compiler_params=pltpu.CompilerParams(
            dimension_semantics=("parallel",),
            vmem_limit_bytes=vmem_limit,
        ),
    )(conv_bf16, scale, shift)

    # back to PyTorch NCHW, drop M/channel padding (extra full pass over output)
    out_nhwc = out2d[:M, :Cout].reshape(N, OH, OW, Cout)
    return jnp.transpose(out_nhwc, (0, 3, 1, 2))


def _reference(x_nchw, w_oihw, gamma, beta, *, stride, padding, dilation, eps):
    conv = jax.lax.conv_general_dilated(
        x_nchw.astype(jnp.float32), w_oihw.astype(jnp.float32),
        window_strides=(stride, stride),
        padding=((padding, padding), (padding, padding)),
        rhs_dilation=(dilation, dilation),
        dimension_numbers=("NCHW", "OIHW", "NCHW"))
    mean = jnp.mean(conv, axis=(0, 2, 3), keepdims=True)
    var = jnp.mean((conv - mean) ** 2, axis=(0, 2, 3), keepdims=True)
    out = (conv - mean) * jax.lax.rsqrt(var + eps)
    out = out * gamma.reshape(1, -1, 1, 1) + beta.reshape(1, -1, 1, 1)
    return out.astype(x_nchw.dtype)


if __name__ == "__main__":
    # BasicConv2d(in_planes=4, out_planes=8, kernel_size=3, stride=1, padding=1)
    N, Cin, H, W = 2, 4, 16, 16
    Cout, Ksz = 8, 3
    stride, padding, dilation = 1, 1, 1

    key = jax.random.PRNGKey(0)
    kx, kw, kg, kb = jax.random.split(key, 4)
    x = jax.random.normal(kx, (N, Cin, H, W), dtype=jnp.float32)
    w = jax.random.normal(kw, (Cout, Cin, Ksz, Ksz), dtype=jnp.float32) * 0.1
    gamma = 1.0 + 0.1 * jax.random.normal(kg, (Cout,), jnp.float32)
    beta = 0.1 * jax.random.normal(kb, (Cout,), jnp.float32)

    # tile_m=128 is clamped to 256 -> a 2-step pass-1 grid at this toy size.
    out = basic_conv2d(x, w, gamma, beta, stride=stride, padding=padding,
                       dilation=dilation, tile_m=128)
    out = jax.block_until_ready(out)

    ref = _reference(x, w, gamma, beta, stride=stride, padding=padding,
                     dilation=dilation, eps=1e-5)
    assert out.shape == (N, Cout, H, W), out.shape
    # bf16 MXU operands + bf16 intermediate (f32 accumulation / BN math)
    assert jnp.allclose(out, ref, atol=5e-2, rtol=5e-2), \
        float(jnp.max(jnp.abs(out - ref)))

    print("KERNEL_OK")
</pallas_src>

<mosaic_0001>
module attributes {stable_mosaic.version = 11 : i64} {
  func.func @_conv_stats_kernel(%arg0: i32, %arg1: memref<256x36xbf16, #tpu.memory_space<vmem>>, %arg2: memref<36x128xbf16, #tpu.memory_space<vmem>>, %arg3: memref<256x128xbf16, #tpu.memory_space<vmem>>, %arg4: memref<1x1x128xf32, #tpu.memory_space<vmem>>, %arg5: memref<1x1x128xf32, #tpu.memory_space<vmem>>) attributes {dimension_semantics = [#tpu.dimension_semantics<parallel>], iteration_bounds = array<i64: 2>, scalar_prefetch = 0 : i64, scratch_operands = 0 : i64, tpu.core_type = #tpu.core_type<tc>, window_params = [{transform_indices = @transform_0, window_bounds = array<i64: 256, 36>}, {pipeline_mode = #tpu.pipeline_mode<synchronous>, transform_indices = @transform_1, window_bounds = array<i64: 36, 128>}, {transform_indices = @transform_2, window_bounds = array<i64: 256, 128>}, {transform_indices = @transform_3, window_bounds = array<i64: 1, 1, 128>}, {transform_indices = @transform_4, window_bounds = array<i64: 1, 1, 128>}]} {
    %c0 = arith.constant 0 : index
    %c0_0 = arith.constant 0 : index
    %0 = vector.load %arg1[%c0, %c0_0] : memref<256x36xbf16, #tpu.memory_space<vmem>>, vector<256x36xbf16>
    %c0_1 = arith.constant 0 : index
    %c0_2 = arith.constant 0 : index
    %1 = vector.load %arg2[%c0_1, %c0_2] : memref<36x128xbf16, #tpu.memory_space<vmem>>, vector<36x128xbf16>
    %cst = arith.constant dense<0.000000e+00> : vector<256x128xf32>
    %2 = tpu.matmul %0, %1, %cst {dimension_numbers = #tpu.dot_dimension_numbers<[1], [0], [0], [1], [0, 0, 1, 1], [], []>} : vector<256x36xbf16>, vector<36x128xbf16>, vector<256x128xf32> -> vector<256x128xf32>
    %3 = arith.truncf %2 : vector<256x128xf32> to vector<256x128xbf16>
    %c0_3 = arith.constant 0 : index
    %c0_4 = arith.constant 0 : index
    %4 = vector.load %arg3[%c0_3, %c0_4] : memref<256x128xbf16, #tpu.memory_space<vmem>>, vector<256x128xbf16>
    tpu.vector_store %arg3[%c0_3, %c0_4], %3 {strides = array<i32>} : memref<256x128xbf16, #tpu.memory_space<vmem>>, vector<256x128xbf16>,
    %cst_5 = arith.constant dense<0.000000e+00> : vector<128xf32>
    %5 = vector.multi_reduction <add>, %2, %cst_5 [0] : vector<256x128xf32> to vector<128xf32>
    %6 = vector.shape_cast %5 : vector<128xf32> to vector<1x128xf32>
    %7 = arith.mulf %2, %2 : vector<256x128xf32>
    %cst_6 = arith.constant dense<0.000000e+00> : vector<128xf32>
    %8 = vector.multi_reduction <add>, %7, %cst_6 [0] : vector<256x128xf32> to vector<128xf32>
    %9 = vector.shape_cast %8 : vector<128xf32> to vector<1x128xf32>
    %10 = vector.shape_cast %6 : vector<1x128xf32> to vector<1x1x128xf32>
    %c0_7 = arith.constant 0 : index
    %c0_8 = arith.constant 0 : index
    %c0_9 = arith.constant 0 : index
    %11 = vector.load %arg4[%c0_7, %c0_8, %c0_9] : memref<1x1x128xf32, #tpu.memory_space<vmem>>, vector<1x1x128xf32>
    tpu.vector_store %arg4[%c0_7, %c0_8, %c0_9], %10 {strides = array<i32>} : memref<1x1x128xf32, #tpu.memory_space<vmem>>, vector<1x1x128xf32>,
    %12 = vector.shape_cast %9 : vector<1x128xf32> to vector<1x1x128xf32>
    %c0_10 = arith.constant 0 : index
    %c0_11 = arith.constant 0 : index
    %c0_12 = arith.constant 0 : index
    %13 = vector.load %arg5[%c0_10, %c0_11, %c0_12] : memref<1x1x128xf32, #tpu.memory_space<vmem>>, vector<1x1x128xf32>
    tpu.vector_store %arg5[%c0_10, %c0_11, %c0_12], %12 {strides = array<i32>} : memref<1x1x128xf32, #tpu.memory_space<vmem>>, vector<1x1x128xf32>,
    return
  }
  func.func @transform_0(%arg0: i32) -> (i32, i32) {
    %c0_i32 = arith.constant 0 : i32
    %c0_i32_0 = arith.constant 0 : i32
    return %arg0, %c0_i32 : i32, i32
  }
  func.func @transform_1(%arg0: i32) -> (i32, i32) {
    %c0_i32 = arith.constant 0 : i32
    %c0_i32_0 = arith.constant 0 : i32
    %c0_i32_1 = arith.constant 0 : i32
    return %c0_i32, %c0_i32_0 : i32, i32
  }
  func.func @transform_2(%arg0: i32) -> (i32, i32) {
    %c0_i32 = arith.constant 0 : i32
    %c0_i32_0 = arith.constant 0 : i32
    return %arg0, %c0_i32 : i32, i32
  }
  func.func @transform_3(%arg0: i32) -> (i32, i32, i32) {
    %c0_i32 = arith.constant 0 : i32
    %c0_i32_0 = arith.constant 0 : i32
    %c0_i32_1 = arith.constant 0 : i32
    return %arg0, %c0_i32, %c0_i32_0 : i32, i32, i32
  }
  func.func @transform_4(%arg0: i32) -> (i32, i32, i32) {
    %c0_i32 = arith.constant 0 : i32
    %c0_i32_0 = arith.constant 0 : i32
    %c0_i32_1 = arith.constant 0 : i32
    return %arg0, %c0_i32, %c0_i32_0 : i32, i32, i32
  }
}

</mosaic_0001>

<bundles_post_ra>
// kernel: tpu_custom_call.1
= control target key start
LH: loop header
LB: loop body
LE: loop exit
PB: predicated region body
PF: predicated region fallthrough
CT: control target
= control target key end

     0   :  { %10 = vsyncpa [#allocation3], 0  ;;  %s1594_s0 = inlined_call_operand.vmem [shape: bf16[512,36], index: 0, kind: input, shape index: {}]   ;;  %s1595_s1 = inlined_call_operand.vmem [shape: bf16[36,128], index: 1, kind: input, shape index: {}]   ;;  %s1596_s2 = inlined_call_operand.hbm [shape: bf16[512,128], index: 2, kind: output, shape index: {0}]   ;;  %s1597_s3 = inlined_call_operand.hbm [shape: f32[2,1,128], index: 3, kind: output, shape index: {1}]   ;;  %s1598_s4 = inlined_call_operand.hbm [shape: f32[2,1,128], index: 4, kind: output, shape index: {2}]  }
   0x1   :  { %12 = vsyncpa [#allocation3 + $0x1], 0 }
   0x2   :  { %13 = vsyncpa [#allocation5], 0 }
   0x3   :  { %15 = vsyncpa [#allocation5 + $0x1], 0  ;;  %s1252_s15 = smov 0   ;;  %s1254_s16 = smov 0  }
   0x4   :  { %s1256_s17 = smov 0   ;;  %s1258_s18 = smov 0  }
   0x5 LB: > { %s1273_s19 = sadd.s32 4294967295, %s1223_s18   ;;  %s827_s20 = sadd.s32 4294967294, %s1223_s18   ;;  %s1223_s18 = sphi %s1258_s18, %s1604_s18   ;;  %s1219_s17 = sphi %s1256_s17, %s1603_s17   ;;  %s1215_s16 = sphi %s1254_s16, %s1602_s16   ;;  %s1211_s15 = sphi %s1252_s15, %s1601_s15  }
   0x6   : > { %s1277_s21 = sadd.s32 1, %s1223_s18   ;;  %s75_s22 = sadd.s32 1, %s1219_s17 }
   0x7   : > { %s72_s23 = ssub.s32 %s1223_s18, %s1277_s21  ;;  %p85_p0 = scmp.ne.s32.totalorder %s1219_s17, %s1215_s16 }
   0x8   : > { %p73_p1 = scmp.eq.s32.totalorder %s72_s23, 0  ;;  %p86_p2 = scmp.eq.s32.totalorder %s1273_s19, 1 }
   0x9   : > { %p91_p3 = scmp.ne.s32.totalorder %s1215_s16, %s1211_s15  ;;  %p92_p4 = scmp.eq.s32.totalorder %s827_s20, 1 }
   0xa   : > { %s1290_s24 = scalar_select %p73_p1, %s1219_s17, %s75_s22  }
   0xb   : > { %p1292_p5 = por %p86_p2, %p85_p0  ;;  %p1296_p6 = por %p92_p4, %p91_p3 }
   0xc   : > { %p830_p7 = scmp.ge.s32.totalorder %s1223_s18, 1  ;;  %p174_p8 = scmp.lt.s32.totalorder %s1223_s18, 3 }
   0xe   : > { %p175_p9 = pnand %p830_p7, %p174_p8 }
   0xf   : > { %s832_s29 = sshll.u32 (!%p175_p9), %s1273_s19, 5  ;;  %s1352_s12 = sand.u32 (!%p175_p9), 1, %s1215_s16  }
  0x10   : > { %178 = sbr.rel (%p175_p9) target bundleno = 297 (0x129), region = 28  ;;  %p209_p10 = scmp.lt.s32.totalorder (!%p175_p9), %s832_s29, 63 }
  0x11   : > { %s831_s13 = sshll.u32 (!%p175_p9), %s1352_s12, 7  ;;  %s945_s22 = sshll.u32 (!%p175_p9), %s1273_s19, 7 }
  0x12   : > { %s1363_s14 = scalar_lea.vmem (!%p175_p9), [#allocation2], %s831_s13  ;;  %s682_s28 = scalar_lea.hbm (!%p175_p9), %s1596_s2, %s945_s22 }
  0x13   : > { %s685_s30 = sshll.u32 (!%p175_p9), %s682_s28, 4  ;;  %s663_s5 = scalar_lea.sflag (!%p175_p9), [#allocation3], %s1352_s12  ;;  %s1452_s30 = int_to_ptr.hbm [resolvable:$true] %s685_s30 }
  0x14   : > { %s1121_s10 = scalar_lea.hbm (!%p175_p9), %s1596_s2, 256 }
  0x15   : > { %v252_v0 = vld [vmem:[%s1595_s1 + $0x10] sm:$0x3]  ;;  %vm397_vm0 = vcmask 1041408   ;;  %s1606_s29 = smov (!%p209_p10, %s832_s29), 63  ;;  %v944_v4 = vld [vmem:[%s1595_s1 + $0x8] sm:$0xff]  ;;  %v943_v5 = vld [vmem:[%s1595_s1] sm:$0xff] }
  0x16   : > { %v342_v1 = vunpack.c.l.b16 %v252_v0  ;;  %s833_s6 = sshll.u32 %s1606_s29, 2  ;;  %vm348_vm1 = vcmask 293888   ;;  %s683_s29 = sshll.u32 %s1363_s14, 4  ;;  %s1450_s29 = int_to_ptr.vmem [resolvable:$true] %s683_s29 }
  0x17   : > { %s1315_s11 = scalar_lea.vmem %s1594_s0, %s833_s6  ;;  %s1115_s6 = sshra.s32 %s1452_s30, 4  ;;  %s1116_s6 = int_to_ptr.hbm [resolvable:$true] %s1115_s6 }
  0x18   : > { %v345_v2 = vpack.c.b16 %v342_v1, %v342_v1  ;;  %v927_v6 = vld [vmem:[%s1315_s11] sm:$0xff]  ;;  %v928_v10 = vld [vmem:[%s1315_s11 + $0x8] sm:$0xff]  ;;  %v929_v14 = vld [vmem:[%s1315_s11 + $0x10] sm:$0xff]  ;;  %s1117_s7 = scalar_lea.hbm %s1116_s6, 128  ;;  %p1122_p0 = scmp.lt.s32.totalorder %s1116_s6, %s1596_s2 }
  0x19   : > { %v931_v7 = vld [vmem:[%s1315_s11 + $0x20] sm:$0xff]  ;;  %v932_v11 = vld [vmem:[%s1315_s11 + $0x28] sm:$0xff]  ;;  %v933_v15 = vld [vmem:[%s1315_s11 + $0x30] sm:$0xff]  ;;  %p1118_p11 = scmp.ne.s32.totalorder %s1116_s6, %s1117_s7  ;;  %p1123_p1 = scmp.lt.s32.totalorder %s1121_s10, %s1117_s7 }
  0x1a   : > { %v399_v3 = vsel %vm397_vm0, %v345_v2, 0  ;;  %v935_v8 = vld [vmem:[%s1315_s11 + $0x40] sm:$0xff]  ;;  %v936_v12 = vld [vmem:[%s1315_s11 + $0x48] sm:$0xff]  ;;  %v937_v16 = vld [vmem:[%s1315_s11 + $0x50] sm:$0xff] }
  0x1b   : > { %406 = vmatpush.bf16.msra.mxu0 %v399_v3  ;;  %1041 = vmatpush.bf16.msra.mxu1 %v399_v3  ;;  %v939_v9 = vld [vmem:[%s1315_s11 + $0x60] sm:$0xff]  ;;  %v940_v13 = vld [vmem:[%s1315_s11 + $0x68] sm:$0xff]  ;;  %v941_v17 = vld [vmem:[%s1315_s11 + $0x70] sm:$0xff]  ;;  %p1119_p12 = pnand %p1118_p11, %p1292_p5  ;;  %p1124_p2 = por %p1123_p1, %p1122_p0 }
  0x1c   : > { %1042 = vmatpush.bf16.msra.mxu2 %v399_v3  ;;  %1043 = vmatpush.bf16.msra.mxu3 %v399_v3  ;;  %v930_v18 = vld [vmem:[%s1315_s11 + $0x18] sm:$0xff] }
  0x1d   : > { %v934_v19 = vld [vmem:[%s1315_s11 + $0x38] sm:$0xff]  ;;  %p1120_p13 = pneg %p1119_p12 }
  0x1e   : > { %v938_v20 = vld [vmem:[%s1315_s11 + $0x58] sm:$0xff] }
  0x1f   : > { %407 = vmatpush.bf16.msra.mxu0 %v944_v4  ;;  %1044 = vmatpush.bf16.msra.mxu1 %v944_v4  ;;  %v942_v21 = vld [vmem:[%s1315_s11 + $0x78] sm:$0xff]  ;;  %p1125_p3 = pnand %p1124_p2, %p1120_p13 }
  0x20   : > { %1045 = vmatpush.bf16.msra.mxu2 %v944_v4  ;;  %1046 = vmatpush.bf16.msra.mxu3 %v944_v4 }
  0x23   : > { %408 = vmatpush.bf16.msra.mxu0 %v943_v5  ;;  %1047 = vmatpush.bf16.msra.mxu1 %v943_v5 }
  0x24   : > { %1048 = vmatpush.bf16.msra.mxu2 %v943_v5  ;;  %1049 = vmatpush.bf16.msra.mxu3 %v943_v5 }
  0x26   : > { %906 = vmatmul.msk.bf16.vlgmr.msra.gmra.mxu0 %vm348_vm1, %v927_v6  ;;  %910 = vmatmul.msk.bf16.vlgmr.msra.gmra.mxu1 %vm348_vm1, %v931_v7 }
  0x27   : > { %914 = vmatmul.msk.bf16.vlgmr.msra.gmra.mxu2 %vm348_vm1, %v935_v8  ;;  %918 = vmatmul.msk.bf16.vlgmr.msra.gmra.mxu3 %vm348_vm1, %v939_v9 }
  0x36   : > { %907 = vmatmul.msk.bf16.gmra.mxu0 %vm348_vm1, %v928_v10  ;;  %911 = vmatmul.msk.bf16.gmra.mxu1 %vm348_vm1, %v932_v11 }
  0x37   : > { %915 = vmatmul.msk.bf16.gmra.mxu2 %vm348_vm1, %v936_v12  ;;  %919 = vmatmul.msk.bf16.gmra.mxu3 %vm348_vm1, %v940_v13 }
  0x46   : > { %908 = vmatmul.msk.bf16.gmra.mxu0 %vm348_vm1, %v929_v14  ;;  %912 = vmatmul.msk.bf16.gmra.mxu1 %vm348_vm1, %v933_v15 }
  0x47   : > { %916 = vmatmul.msk.bf16.gmra.mxu2 %vm348_vm1, %v937_v16  ;;  %920 = vmatmul.msk.bf16.gmra.mxu3 %vm348_vm1, %v941_v17 }
  0x56   : > { %909 = vmatmul.msk.bf16.gmra.mxu0 %vm348_vm1, %v930_v18  ;;  %913 = vmatmul.msk.bf16.gmra.mxu1 %vm348_vm1, %v934_v19 }
  0x57   : > { %917 = vmatmul.msk.bf16.gmra.mxu2 %vm348_vm1, %v938_v20  ;;  %921 = vmatmul.msk.bf16.gmra.mxu3 %vm348_vm1, %v942_v21 }
  0xa3   : > { %v410_v22 = vpop.f32.mrf.mxu0  ;;  %v1349_v23 = vpop.f32.mrf.mxu1 }
  0xa4   : > { %v591_v55 = vmul.f32 %v410_v22, %v410_v22 }
  0xaa   : > { %v1355_v24 = vpop.f32.mrf.mxu2  ;;  %v1361_v29 = vpop.f32.mrf.mxu3 }
  0xab   : > { %v412_v25 = vpop.f32.mrf.mxu0  ;;  %v1357_v26 = vpop.f32.mrf.mxu1 }
  0xac   : > { %v949_v27 = vpack.c.bf16 %v412_v25, %v410_v22  ;;  %v969_v28 = vpack.c.bf16 %v1357_v26, %v1349_v23  ;;  %v592_v54 = vmul.f32 %v412_v25, %v412_v25  ;;  %v554_v57 = vadd.f32 %v412_v25, %v410_v22 }
  0xad   : > { %v599_v25 = vmul.f32 %v1349_v23, %v1349_v23 }
  0xae   : > { %950 = vst [vmem:[%s1363_s14] sm:$0xff] %v949_v27   ;;  %v623_v58 = vadd.f32 %v592_v54, %v591_v55 }
  0xaf   : > { %1029 = vst [vmem:[%s1363_s14 + $0x20] sm:$0xff] %v969_v28  }
  0xb2   : > { %v1367_v30 = vpop.f32.mrf.mxu2  ;;  %v1373_v34 = vpop.f32.mrf.mxu3 }
  0xb3   : > { %v415_v31 = vpop.f32.mrf.mxu0  ;;  %v1369_v32 = vpop.f32.mrf.mxu1  ;;  %v989_v33 = vpack.c.bf16 %v1367_v30, %v1355_v24  ;;  %v1009_v35 = vpack.c.bf16 %v1373_v34, %v1361_v29 }
  0xb4   : > { %v593_v56 = vmul.f32 %v415_v31, %v415_v31  ;;  %v555_v60 = vadd.f32 %v554_v57, %v415_v31 }
  0xb5   : > { %1033 = vst [vmem:[%s1363_s14 + $0x40] sm:$0xff] %v989_v33  }
  0xb6   : > { %1037 = vst [vmem:[%s1363_s14 + $0x60] sm:$0xff] %v1009_v35   ;;  %v624_v62 = vadd.f32 %v623_v58, %v593_v56 }
  0xba   : > { %v1379_v36 = vpop.f32.mrf.mxu2  ;;  %v1385_v41 = vpop.f32.mrf.mxu3 }
  0xbb   : > { %v417_v37 = vpop.f32.mrf.mxu0  ;;  %v1381_v38 = vpop.f32.mrf.mxu1 }
  0xbc   : > { %v954_v39 = vpack.c.bf16 %v417_v37, %v415_v31  ;;  %v974_v40 = vpack.c.bf16 %v1381_v38, %v1369_v32  ;;  %v594_v59 = vmul.f32 %v417_v37, %v417_v37  ;;  %v556_v3 = vadd.f32 %v555_v60, %v417_v37 }
  0xbd   : > { %v600_v31 = vmul.f32 %v1357_v26, %v1357_v26  ;;  %v601_v37 = vmul.f32 %v1369_v32, %v1369_v32 }
  0xbe   : > { %1026 = vst [vmem:[%s1363_s14 + $0x8] sm:$0xff] %v954_v39   ;;  %v625_v5 = vadd.f32 %v624_v62, %v594_v59 }
  0xbf   : > { %1030 = vst [vmem:[%s1363_s14 + $0x28] sm:$0xff] %v974_v40  }
  0xc2   : > { %v1389_v42 = vpop.f32.mrf.mxu2  ;;  %v1395_v46 = vpop.f32.mrf.mxu3 }
  0xc3   : > { %v420_v43 = vpop.f32.mrf.mxu0  ;;  %v1391_v44 = vpop.f32.mrf.mxu1  ;;  %v994_v45 = vpack.c.bf16 %v1389_v42, %v1379_v36  ;;  %v1014_v47 = vpack.c.bf16 %v1395_v46, %v1385_v41 }
  0xc4   : > { %v595_v63 = vmul.f32 %v420_v43, %v420_v43  ;;  %v557_v8 = vadd.f32 %v556_v3, %v420_v43 }
  0xc5   : > { %1034 = vst [vmem:[%s1363_s14 + $0x48] sm:$0xff] %v994_v45   ;;  %v602_v45 = vmul.f32 %v1381_v38, %v1381_v38 }
  0xc6   : > { %1038 = vst [vmem:[%s1363_s14 + $0x68] sm:$0xff] %v1014_v47   ;;  %v626_v9 = vadd.f32 %v625_v5, %v595_v63 }
  0xca   : > { %v1401_v48 = vpop.f32.mrf.mxu2  ;;  %v1407_v53 = vpop.f32.mrf.mxu3 }
  0xcb   : > { %v422_v49 = vpop.f32.mrf.mxu0  ;;  %v1403_v50 = vpop.f32.mrf.mxu1 }
  0xcc   : > { %v959_v51 = vpack.c.bf16 %v422_v49, %v420_v43  ;;  %v979_v52 = vpack.c.bf16 %v1403_v50, %v1391_v44  ;;  %v596_v6 = vmul.f32 %v422_v49, %v422_v49  ;;  %v558_v11 = vadd.f32 %v557_v8, %v422_v49 }
  0xce   : > { %1027 = vst [vmem:[%s1363_s14 + $0x10] sm:$0xff] %v959_v51   ;;  %v627_v12 = vadd.f32 %v626_v9, %v596_v6  ;;  %v603_v51 = vmul.f32 %v1391_v44, %v1391_v44 }
  0xcf   : > { %1031 = vst [vmem:[%s1363_s14 + $0x30] sm:$0xff] %v979_v52  }
  0xd2   : > { %v1411_v61 = vpop.f32.mrf.mxu2  ;;  %v1417_v4 = vpop.f32.mrf.mxu3 }
  0xd3   : > { %v425_v0 = vpop.f32.mrf.mxu0  ;;  %v1413_v1 = vpop.f32.mrf.mxu1  ;;  %v999_v2 = vpack.c.bf16 %v1411_v61, %v1401_v48  ;;  %v1019_v7 = vpack.c.bf16 %v1417_v4, %v1407_v53 }
  0xd4   : > { %v597_v10 = vmul.f32 %v425_v0, %v425_v0  ;;  %v559_v13 = vadd.f32 %v558_v11, %v425_v0 }
  0xd5   : > { %1035 = vst [vmem:[%s1363_s14 + $0x50] sm:$0xff] %v999_v2  }
  0xd6   : > { %1039 = vst [vmem:[%s1363_s14 + $0x70] sm:$0xff] %v1019_v7   ;;  %v628_v15 = vadd.f32 %v627_v12, %v597_v10 }
  0xda   : > { %v1423_v14 = vpop.f32.mrf.mxu2  ;;  %v1427_v22 = vpop.f32.mrf.mxu3 }
  0xdb   : > { %v427_v16 = vpop.f32.mrf.mxu0  ;;  %v447_v17 = vpop.f32.mrf.mxu1 }
  0xdc   : > { %v964_v18 = vpack.c.bf16 %v427_v16, %v425_v0  ;;  %v560_v19 = vadd.f32 %v559_v13, %v427_v16  ;;  %v598_v20 = vmul.f32 %v427_v16, %v427_v16  ;;  %v984_v21 = vpack.c.bf16 %v447_v17, %v1413_v1 }
  0xde   : > { %1028 = vst [vmem:[%s1363_s14 + $0x18] sm:$0xff] %v964_v18   ;;  %v561_v27 = vadd.f32 %v560_v19, %v1349_v23  ;;  %v629_v28 = vadd.f32 %v628_v15, %v598_v20 }
  0xdf   : > { %1032 = vst [vmem:[%s1363_s14 + $0x38] sm:$0xff] %v984_v21  }
  0xe0   : > { %v562_v33 = vadd.f32 %v561_v27, %v1357_v26  ;;  %v630_v35 = vadd.f32 %v629_v28, %v599_v25 }
  0xe2   : > { %v563_v23 = vadd.f32 %v562_v33, %v1369_v32  ;;  %v631_v39 = vadd.f32 %v630_v35, %v600_v31  ;;  %v467_v40 = vpop.f32.mrf.mxu2  ;;  %v1448_v49 = vpop.f32.mrf.mxu3 }
  0xe3   : > { %v1004_v43 = vpack.c.bf16 %v467_v40, %v1423_v14  ;;  %v1024_v32 = vpack.c.bf16 %v1448_v49, %v1427_v22 }
  0xe4   : > { %v632_v47 = vadd.f32 %v631_v39, %v601_v37  ;;  %v564_v26 = vadd.f32 %v563_v23, %v1381_v38  ;;  %v604_v38 = vmul.f32 %v1403_v50, %v1403_v50 }
  0xe5   : > { %1036 = vst [vmem:[%s1363_s14 + $0x58] sm:$0xff] %v1004_v43  }
  0xe6   : > { %v565_v52 = vadd.f32 %v564_v26, %v1391_v44  ;;  %v633_v54 = vadd.f32 %v632_v47, %v602_v45  ;;  %1040 = vst [vmem:[%s1363_s14 + $0x78] sm:$0xff] %v1024_v32  }
  0xe8   : > { %v566_v55 = vadd.f32 %v565_v52, %v1403_v50  ;;  %v634_v56 = vadd.f32 %v633_v54, %v603_v51 }
  0xe9   : > { %1128 = shalt.err (!%p1125_p3)
}
  0xea   : > { %s1225_s14 = smov 64   ;;  %s1226_s22 = smov 4   ;;  %v567_v44 = vadd.f32 %v566_v55, %v1413_v1  ;;  %v605_v50 = vmul.f32 %v1413_v1, %v1413_v1  ;;  %v635_v57 = vadd.f32 %v634_v56, %v604_v38  ;;  %v606_v60 = vmul.f32 %v447_v17, %v447_v17 }
  0xeb   : > { %1050 = dma.vmem_to_hbm [thread:$0]  (%p1292_p5), %s1450_s29, 2048, %s1452_s30, %s663_s5, %s1225_s14, %s1225_s14, %s1226_s22   ;;  %v607_v62 = vmul.f32 %v1355_v24, %v1355_v24  ;;  %v608_v2 = vmul.f32 %v1367_v30, %v1367_v30  ;;  %v609_v6 = vmul.f32 %v1379_v36, %v1379_v36  ;;  %v610_v8 = vmul.f32 %v1389_v42, %v1389_v42 }
  0xec   : > { %v636_v58 = vadd.f32 %v635_v57, %v605_v50  ;;  %v568_v59 = vadd.f32 %v567_v44, %v447_v17  ;;  %v612_v13 = vmul.f32 %v1411_v61, %v1411_v61  ;;  %v613_v17 = vmul.f32 %v1423_v14, %v1423_v14  ;;  %s697_s28 = scalar_lea.hbm %s1597_s3, %s1273_s19  ;;  %s667_s29 = sand.u32 1, %s1273_s19  }
  0xed   : > { %v614_v19 = vmul.f32 %v467_v40, %v467_v40  ;;  %v615_v20 = vmul.f32 %v1361_v29, %v1361_v29  ;;  %v616_v25 = vmul.f32 %v1373_v34, %v1373_v34  ;;  %v617_v28 = vmul.f32 %v1385_v41, %v1385_v41  ;;  %s710_s6 = scalar_lea.hbm %s1598_s4, %s1273_s19  ;;  %s201_s7 = scalar_lea.vmem [#allocation4], %s1352_s12 }
  0xee   : > { %v569_v63 = vadd.f32 %v568_v59, %v1355_v24  ;;  %v637_v0 = vadd.f32 %v636_v58, %v606_v60  ;;  %v611_v24 = vmul.f32 %v1401_v48, %v1401_v48  ;;  %v618_v33 = vmul.f32 %v1395_v46, %v1395_v46  ;;  %s1536_s8 = sshll.u32 %s201_s7, 4  ;;  %s1538_s9 = sshll.u32 %s697_s28, 4  ;;  %s700_s8 = int_to_ptr.vmem [resolvable:$true] %s1536_s8  ;;  %s702_s9 = int_to_ptr.hbm [resolvable:$true] %s1538_s9 }
  0xef   : > { %v622_v26 = vmul.f32 %v1448_v49, %v1448_v49  ;;  %s207_s10 = scalar_lea.vmem [#allocation6], %s1352_s12  ;;  %s1543_s13 = sshll.u32 %s710_s6, 4  ;;  %s715_s13 = int_to_ptr.hbm [resolvable:$true] %s1543_s13 }
  0xf0   : > { %v570_v3 = vadd.f32 %v569_v63, %v1367_v30  ;;  %v638_v5 = vadd.f32 %v637_v0, %v607_v62  ;;  %s1541_s11 = sshll.u32 %s207_s10, 4  ;;  %s668_s19 = scalar_lea.sflag [#allocation5], %s667_s29  ;;  %s713_s11 = int_to_ptr.vmem [resolvable:$true] %s1541_s11 }
  0xf1   : > { %s1143_s14 = sshra.s32 %s702_s9, 4  ;;  %s1149_s27 = scalar_lea.hbm %s1597_s3, 2  ;;  %s1144_s14 = int_to_ptr.hbm [resolvable:$true] %s1143_s14 }
  0xf2   : > { %v571_v1 = vadd.f32 %v570_v3, %v1379_v36  ;;  %v639_v7 = vadd.f32 %v638_v5, %v608_v2  ;;  %s1145_s22 = scalar_lea.hbm %s1144_s14, 1  ;;  %p1150_p9 = scmp.lt.s32.totalorder %s1144_s14, %s1597_s3 }
  0xf3   : > { %p1146_p4 = scmp.ne.s32.totalorder %s1144_s14, %s1145_s22  ;;  %p1151_p10 = scmp.lt.s32.totalorder %s1149_s27, %s1145_s22 }
  0xf4   : > { %v640_v9 = vadd.f32 %v639_v7, %v609_v6  ;;  %v572_v10 = vadd.f32 %v571_v1, %v1389_v42 }
  0xf5   : > { %p1147_p7 = pnand %p1146_p4, %p1292_p5  ;;  %p1152_p11 = por %p1151_p10, %p1150_p9 }
  0xf6   : > { %v573_v11 = vadd.f32 %v572_v10, %v1401_v48  ;;  %v641_v12 = vadd.f32 %v640_v9, %v610_v8 }
  0xf7   : > { %p1148_p8 = pneg %p1147_p7 }
  0xf8   : > { %v574_v30 = vadd.f32 %v573_v11, %v1411_v61  ;;  %v642_v15 = vadd.f32 %v641_v12, %v611_v24 }
  0xf9   : > { %p1153_p12 = pnand %p1152_p11, %p1148_p8 }
  0xfa   : > { %v643_v36 = vadd.f32 %v642_v15, %v612_v13  ;;  %v575_v16 = vadd.f32 %v574_v30, %v1423_v14 }
  0xfc   : > { %v644_v18 = vadd.f32 %v643_v36, %v613_v17  ;;  %v576_v42 = vadd.f32 %v575_v16, %v467_v40 }
  0xfe   : > { %v577_v48 = vadd.f32 %v576_v42, %v1361_v29  ;;  %v645_v21 = vadd.f32 %v644_v18, %v614_v19  ;;  %v619_v29 = vmul.f32 %v1407_v53, %v1407_v53 }
 0x100   : > { %v578_v61 = vadd.f32 %v577_v48, %v1373_v34  ;;  %v646_v27 = vadd.f32 %v645_v21, %v615_v20 }
 0x102   : > { %v579_v14 = vadd.f32 %v578_v61, %v1385_v41  ;;  %v647_v31 = vadd.f32 %v646_v27, %v616_v25  ;;  %v620_v41 = vmul.f32 %v1417_v4, %v1417_v4 }
 0x104   : > { %v648_v35 = vadd.f32 %v647_v31, %v617_v28  ;;  %v580_v37 = vadd.f32 %v579_v14, %v1395_v46  ;;  %v621_v46 = vmul.f32 %v1427_v22, %v1427_v22 }
 0x106   : > { %v581_v23 = vadd.f32 %v580_v37, %v1407_v53  ;;  %v649_v39 = vadd.f32 %v648_v35, %v618_v33 }
 0x108   : > { %v582_v34 = vadd.f32 %v581_v23, %v1417_v4  ;;  %v650_v40 = vadd.f32 %v649_v39, %v619_v29 }
 0x10a   : > { %v651_v43 = vadd.f32 %v650_v40, %v620_v41  ;;  %v583_v45 = vadd.f32 %v582_v34, %v1427_v22 }
 0x10c   : > { %v652_v47 = vadd.f32 %v651_v43, %v621_v46  ;;  %v584_v53 = vadd.f32 %v583_v45, %v1448_v49 }
 0x10e   : > { %v585_v32 = vrot.slane %v584_v53, 4  ;;  %v653_v51 = vadd.f32 %v652_v47, %v622_v26 }
 0x110   : > { %v586_v52 = vadd.f32 %v585_v32, %v584_v53  ;;  %v654_v4 = vrot.slane %v653_v51, 4 }
 0x112   : > { %v587_v54 = vrot.slane %v586_v52, 2  ;;  %v655_v38 = vadd.f32 %v654_v4, %v653_v51 }
 0x114   : > { %v588_v55 = vadd.f32 %v587_v54, %v586_v52  ;;  %v656_v22 = vrot.slane %v655_v38, 2 }
 0x116   : > { %v657_v49 = vadd.f32 %v656_v22, %v655_v38  ;;  %v589_v56 = vrot.slane %v588_v55, 1 }
 0x118   : > { %v590_v44 = vadd.f32 %v589_v56, %v588_v55  ;;  %v658_v50 = vrot.slane %v657_v49, 1 }
 0x11a   : > { %660 = vst [vmem:[%s201_s7] sm:$0x1] %v590_v44  ;;  %v659_v57 = vadd.f32 %v658_v50, %v657_v49 }
 0x11b   : > { %1156 = shalt.err (!%p1153_p12)
}
 0x11c   : > { %1051 = dma.vmem_to_hbm [thread:$0]  (%p1292_p5), %s700_s8, 16, %s702_s9, %s668_s19   ;;  %661 = vst [vmem:[%s207_s10] sm:$0x1] %v659_v57 }
 0x11d   : > { %s1171_s29 = sshra.s32 %s715_s13, 4  ;;  %s1177_s14 = scalar_lea.hbm %s1598_s4, 2  ;;  %s1172_s29 = int_to_ptr.hbm [resolvable:$true] %s1171_s29 }
 0x11e   : > { %s1173_s5 = scalar_lea.hbm %s1172_s29, 1  ;;  %p1178_p2 = scmp.lt.s32.totalorder %s1172_s29, %s1598_s4 }
 0x11f   : > { %p1174_p13 = scmp.ne.s32.totalorder %s1172_s29, %s1173_s5  ;;  %p1179_p3 = scmp.lt.s32.totalorder %s1177_s14, %s1173_s5 }
 0x121   : > { %p1175_p0 = pnand %p1174_p13, %p1292_p5  ;;  %p1180_p4 = por %p1179_p3, %p1178_p2 }
 0x123   : > { %p1176_p1 = pneg %p1175_p0 }
 0x125   : > { %p1181_p7 = pnand %p1180_p4, %p1176_p1 }
 0x127   : > { %1184 = shalt.err (!%p1181_p7)
}
 0x128   : > { %1052 = dma.vmem_to_hbm [thread:$0]  (%p1292_p5), %s713_s11, 16, %s715_s13, %s668_s19  }
 0x129 PF: > { %p1066_p8 = scmp.ge.s32.totalorder %s1223_s18, 2  ;;  %s726_s8 = sand.u32 1, %s1211_s15  }
 0x12a   : > { %s727_s9 = scalar_lea.sflag [#allocation3], %s726_s8 }
 0x12b   : > { %p1057_p9 = pnand %p1066_p8, %p1296_p6 }
 0x12d   : > { %p1058_p10 = pneg %p1057_p9 }
 0x12f   : > { %1202 = dma.done.wait (%p1058_p10), %s727_s9, 2048  }
 0x130   : > { %1204 = vsyncadd (%p1058_p10), %s727_s9, 4294965248  ;;  %s736_s25 = sand.u32 1, %s827_s20  }
 0x131   : > { %s737_s10 = scalar_lea.sflag [#allocation5], %s736_s25 }
 0x132   : > { %1206 = dma.done.wait (%p1058_p10), %s737_s10, 32  }
 0x133   : > { %1208 = vsyncadd (%p1058_p10), %s737_s10, 4294967264  ;;  %p18_p5 = scmp.ge.s32.totalorder %s1277_s21, 4   ;;  %s1601_s15 = smov %s1215_s16 }
 0x134   : > { %s1602_s16 = smov %s1219_s17  ;;  %s1603_s17 = smov %s1290_s24 }
 0x135   : > { %s1604_s18 = smov %s1277_s21  ;;  %20 = sbr.rel (!%p18_p5) target bundleno = 5 (0x5), region = 95 }
 0x13a   :  { %751 = vsyncpa [#allocation3], 1 }
 0x13b   :  { %753 = vsyncpa [#allocation3 + $0x1], 1 }
 0x13c   :  { %754 = vsyncpa [#allocation5], 1 }
 0x13d   :  { %756 = vsyncpa [#allocation5 + $0x1], 1 }

</bundles_post_ra>
